<compile_context>
chip_gen: v7x
topology: tpu7x:2x2x1
jax: 0.10.0
libtpu: 0.0.40
codegen_flags: <defaults>
</compile_context>

<pallas_src>
import functools

import jax
import jax.numpy as jnp
from jax import lax
from jax.experimental import pallas as pl
from jax.experimental.pallas import tpu as pltpu


def _pow_gamma(x, gamma):
    """x**gamma, specialized to a multiply chain for small integer gamma."""
    g = float(gamma)
    gi = int(g)
    if g == float(gi) and 0 <= gi <= 4:
        if gi == 0:
            return jnp.ones_like(x)
        y = x
        for _ in range(gi - 1):
            y = y * x
        return y
    # Non-integer gamma: pow lowers to exp(g*log(x)); clamp to dodge log(0) at x == 0.
    return jnp.power(jnp.maximum(x, 1e-30), g)


def _focal_loss_kernel(pred_ref, tgt_ref, alpha_ref, out_ref, *,
                       gamma, lb_smooth, n_valid, use_alpha, neg_class):
    """One tile of rows; emits the partial loss-sum for this tile.

    pred_ref : (C, tile)   float   -- logits, classes on sublanes, rows on lanes
    tgt_ref  : (1, tile)   int32   -- class index per row
    alpha_ref: (C, 1)      float32 -- per-class alpha (resident; unused if use_alpha=False)
    out_ref  : (1, 1, 1)   float32 -- partial sum of per-row losses for this tile
    """
    i = pl.program_id(0)

    logits = pred_ref[...].astype(jnp.float32)                 # (C, tile)
    tgt = tgt_ref[...]                                         # (1, tile)
    C, tile = logits.shape

    # one_hot(target) via sublane iota compared against the (1, tile) target row.
    class_ids = lax.broadcasted_iota(jnp.int32, logits.shape, 0)   # (C, tile)
    class_mask = (class_ids == tgt).astype(jnp.float32)            # (C, tile)

    # log-prob of the true class via log-sum-exp over the (cheap) sublane class axis.
    m = jnp.max(logits, axis=0, keepdims=True)                     # (1, tile)
    denom = jnp.sum(jnp.exp(logits - m), axis=0, keepdims=True)    # (1, tile)
    logit_t = jnp.sum(logits * class_mask, axis=0, keepdims=True)  # (1, tile)
    log_p = logit_t - m - jnp.log(denom)                           # (1, tile)
    probs = jnp.exp(log_p)                                         # (1, tile)

    # Focal modulating factor: rows with target == neg_class use the lb_smooth clamp.
    if lb_smooth != 0.0:
        is_neg = tgt == neg_class
        base = jnp.where(is_neg,
                         jnp.maximum(1.0 - lb_smooth - probs, 0.0),
                         1.0 - probs)
    else:
        # lb_smooth == 0: both branches equal (1 - p) since p <= 1.
        base = 1.0 - probs

    loss = -_pow_gamma(base, gamma) * log_p                        # (1, tile)

    if use_alpha:
        alpha_row = jnp.sum(alpha_ref[...].astype(jnp.float32) * class_mask,
                            axis=0, keepdims=True)                 # (1, tile)
        loss = alpha_row * loss

    # Zero out padded rows (global row index >= n_valid).
    lane = lax.broadcasted_iota(jnp.int32, (1, tile), 1)
    valid = ((i * tile + lane) < n_valid).astype(jnp.float32)
    loss = loss * valid

    out_ref[...] = jnp.sum(loss).reshape(1, 1, 1)


def multi_ce_focal_loss(predict, target, alpha=None, *, gamma=2.0, lb_smooth=0.0,
                        neg_class=2, reduction="mean", tile_n=2048):
    """predict: (..., C) float, target: (...) int -- mirrors the module's .view(-1, C)."""
    C = predict.shape[-1]
    predict2d = predict.reshape(-1, C)
    target1d = target.reshape(-1).astype(jnp.int32)
    N = predict2d.shape[0]

    # Lane-dense tile: multiple of 128 lanes, capped by tile_n; pad N up to a tile multiple.
    tile = max(128, (int(tile_n) // 128) * 128)
    tile = min(tile, pl.cdiv(N, 128) * 128)
    n_pad = pl.cdiv(N, tile) * tile
    num_tiles = n_pad // tile

    # Transpose so rows live on lanes (classes on sublanes); pad with zero-weight rows.
    pred_t = jnp.transpose(predict2d, (1, 0))                     # (C, N)
    pad = n_pad - N
    if pad:
        pred_t = jnp.pad(pred_t, ((0, 0), (0, pad)))
        target1d = jnp.pad(target1d, (0, pad))
    tgt_row = target1d.reshape(1, n_pad)

    use_alpha = alpha is not None
    alpha_col = (jnp.asarray(alpha, jnp.float32).reshape(C, 1) if use_alpha
                 else jnp.ones((C, 1), jnp.float32))

    kernel = functools.partial(
        _focal_loss_kernel, gamma=float(gamma), lb_smooth=float(lb_smooth),
        n_valid=int(N), use_alpha=bool(use_alpha), neg_class=int(neg_class))

    # TODO(synk): if C ever becomes large, bound tile so C*tile*4B*2 buffers fits v7x's
    # smaller VMEM and raise vmem_limit_bytes; irrelevant for C=4.
    partials = pl.pallas_call(
        kernel,
        out_shape=jax.ShapeDtypeStruct((num_tiles, 1, 1), jnp.float32),
        grid_spec=pltpu.PrefetchScalarGridSpec(
            num_scalar_prefetch=0,
            grid=(num_tiles,),
            in_specs=[
                pl.BlockSpec((C, tile), lambda i: (0, i)),   # logits tile (lane-dense)
                pl.BlockSpec((1, tile), lambda i: (0, i)),   # target row tile
                pl.BlockSpec((C, 1), lambda i: (0, 0)),      # alpha (resident)
            ],
            out_specs=pl.BlockSpec((1, 1, 1), lambda i: (i, 0, 0)),  # per-tile partial sum
        ),
        compiler_params=pltpu.CompilerParams(
            dimension_semantics=("parallel",),               # megacore-friendly on v7x
        ),
    )(pred_t, tgt_row, alpha_col)

    total = jnp.sum(partials)
    if reduction == "mean":
        return total / N
    return total


def _reference_focal_loss(predict, target, alpha=None, gamma=2.0, lb_smooth=0.0,
                          neg_class=2, reduction="mean"):
    """Pure-JAX reference mirroring MultiCEFocalLoss_New.forward."""
    C = predict.shape[-1]
    predict = predict.reshape(-1, C).astype(jnp.float32)
    target = target.reshape(-1)
    pt = jax.nn.softmax(predict, axis=-1)
    mask = jax.nn.one_hot(target, C, dtype=jnp.float32)
    a = (jnp.ones(target.shape, jnp.float32) if alpha is None
         else jnp.asarray(alpha, jnp.float32)[target])
    probs = jnp.sum(pt * mask, axis=-1)
    log_p = jnp.log(probs)
    factor = jnp.where(target == neg_class,
                       jnp.maximum(1.0 - lb_smooth - probs, 0.0),
                       1.0 - probs)
    loss = -a * jnp.power(factor, gamma) * log_p
    return jnp.mean(loss) if reduction == "mean" else jnp.sum(loss)


if __name__ == "__main__":
    class_num = 4
    key = jax.random.PRNGKey(0)

    # Test 1: module defaults (alpha=None, gamma=2, lb_smooth=0); batch=2, seq=8.
    k1, k2, k3, k4, k5 = jax.random.split(key, 5)
    predict = jax.random.normal(k1, (2, 8, class_num), dtype=jnp.float32)
    target = jax.random.randint(k2, (2, 8), 0, class_num, dtype=jnp.int32)
    loss = jax.block_until_ready(multi_ce_focal_loss(predict, target, gamma=2.0))
    ref = _reference_focal_loss(predict, target, gamma=2.0)
    assert jnp.allclose(loss, ref, rtol=1e-5, atol=1e-6), (loss, ref)

    # Test 2: explicit per-class alpha + nonzero label smoothing (negative-class clamp path).
    alpha = jnp.array([0.5, 1.0, 2.0, 1.5], dtype=jnp.float32)
    loss2 = jax.block_until_ready(
        multi_ce_focal_loss(predict, target, alpha, gamma=2.0, lb_smooth=0.1))
    ref2 = _reference_focal_loss(predict, target, alpha, gamma=2.0, lb_smooth=0.1)
    assert jnp.allclose(loss2, ref2, rtol=1e-5, atol=1e-6), (loss2, ref2)

    # Test 3: multi-tile path (grid > 1, "parallel" partial sums).
    predict3 = jax.random.normal(k3, (512, class_num), dtype=jnp.float32)
    target3 = jax.random.randint(k4, (512,), 0, class_num, dtype=jnp.int32)
    loss3 = jax.block_until_ready(
        multi_ce_focal_loss(predict3, target3, alpha, gamma=2.0, tile_n=128))
    ref3 = _reference_focal_loss(predict3, target3, alpha, gamma=2.0)
    assert jnp.allclose(loss3, ref3, rtol=1e-5, atol=1e-6), (loss3, ref3)

    print("KERNEL_OK")
</pallas_src>

<mosaic_0001>
module attributes {stable_mosaic.version = 11 : i64} {
  func.func @_focal_loss_kernel(%arg0: i32, %arg1: memref<4x128xf32, #tpu.memory_space<vmem>>, %arg2: memref<1x128xi32, #tpu.memory_space<vmem>>, %arg3: memref<4x1xf32, #tpu.memory_space<vmem>>, %arg4: memref<1x1x1xf32, #tpu.memory_space<vmem>>) attributes {dimension_semantics = [#tpu.dimension_semantics<parallel>], iteration_bounds = array<i64: 1>, scalar_prefetch = 0 : i64, scratch_operands = 0 : i64, tpu.core_type = #tpu.core_type<tc>, window_params = [{transform_indices = @transform_0, window_bounds = array<i64: 4, 128>}, {transform_indices = @transform_1, window_bounds = array<i64: 1, 128>}, {pipeline_mode = #tpu.pipeline_mode<synchronous>, transform_indices = @transform_2, window_bounds = array<i64: 4, 1>}, {transform_indices = @transform_3, window_bounds = array<i64: 1, 1, 1>}]} {
    %c0 = arith.constant 0 : index
    %c0_0 = arith.constant 0 : index
    %0 = vector.load %arg1[%c0, %c0_0] : memref<4x128xf32, #tpu.memory_space<vmem>>, vector<4x128xf32>
    %c0_1 = arith.constant 0 : index
    %c0_2 = arith.constant 0 : index
    %1 = vector.load %arg2[%c0_1, %c0_2] : memref<1x128xi32, #tpu.memory_space<vmem>>, vector<1x128xi32>
    %2 = tpu.iota {dimensions = array<i32: 0>} : vector<4x128xi32>
    %3 = vector.broadcast %1 : vector<1x128xi32> to vector<4x128xi32>
    %4 = arith.cmpi eq, %2, %3 : vector<4x128xi32>
    %5 = arith.extui %4 : vector<4x128xi1> to vector<4x128xi32>
    %6 = arith.sitofp %5 : vector<4x128xi32> to vector<4x128xf32>
    %cst = arith.constant dense<0xFF800000> : vector<128xf32>
    %7 = vector.multi_reduction <maximumf>, %0, %cst [0] : vector<4x128xf32> to vector<128xf32>
    %8 = vector.shape_cast %7 : vector<128xf32> to vector<1x128xf32>
    %9 = vector.broadcast %8 : vector<1x128xf32> to vector<4x128xf32>
    %10 = arith.subf %0, %9 : vector<4x128xf32>
    %11 = math.exp %10 : vector<4x128xf32>
    %cst_3 = arith.constant dense<0.000000e+00> : vector<128xf32>
    %12 = vector.multi_reduction <add>, %11, %cst_3 [0] : vector<4x128xf32> to vector<128xf32>
    %13 = vector.shape_cast %12 : vector<128xf32> to vector<1x128xf32>
    %14 = arith.mulf %0, %6 : vector<4x128xf32>
    %cst_4 = arith.constant dense<0.000000e+00> : vector<128xf32>
    %15 = vector.multi_reduction <add>, %14, %cst_4 [0] : vector<4x128xf32> to vector<128xf32>
    %16 = vector.shape_cast %15 : vector<128xf32> to vector<1x128xf32>
    %17 = arith.subf %16, %8 : vector<1x128xf32>
    %18 = math.log %13 : vector<1x128xf32>
    %19 = arith.subf %17, %18 : vector<1x128xf32>
    %20 = math.exp %19 : vector<1x128xf32>
    %cst_5 = arith.constant 1.000000e+00 : f32
    %21 = vector.broadcast %cst_5 : f32 to vector<1x128xf32>
    %22 = arith.subf %21, %20 : vector<1x128xf32>
    %23 = arith.mulf %22, %22 : vector<1x128xf32>
    %cst_6 = arith.constant 0.000000e+00 : f32
    %24 = vector.broadcast %cst_6 : f32 to vector<1x128xf32>
    %25 = arith.subf %24, %23 : vector<1x128xf32>
    %26 = arith.mulf %25, %19 : vector<1x128xf32>
    %27 = tpu.iota {dimensions = array<i32: 1>} : vector<1x128xi32>
    %c128_i32 = arith.constant 128 : i32
    %28 = arith.muli %arg0, %c128_i32 : i32
    %29 = vector.broadcast %28 : i32 to vector<1x128xi32>
    %30 = arith.addi %29, %27 : vector<1x128xi32>
    %c16_i32 = arith.constant 16 : i32
    %31 = vector.broadcast %c16_i32 : i32 to vector<1x128xi32>
    %32 = arith.cmpi slt, %30, %31 : vector<1x128xi32>
    %33 = arith.extui %32 : vector<1x128xi1> to vector<1x128xi32>
    %34 = arith.sitofp %33 : vector<1x128xi32> to vector<1x128xf32>
    %35 = arith.mulf %26, %34 : vector<1x128xf32>
    %36 = vector.shape_cast %35 : vector<1x128xf32> to vector<1x1x128xf32>
    %cst_7 = arith.constant dense<0.000000e+00> : vector<1xf32>
    %37 = vector.multi_reduction <add>, %36, %cst_7 [1, 2] : vector<1x1x128xf32> to vector<1xf32>
    %38 = vector.shape_cast %37 : vector<1xf32> to vector<1x1x1xf32>
    %39 = vector.extract %38[0, 0, 0] : f32 from vector<1x1x1xf32>
    %40 = vector.broadcast %39 : f32 to vector<1x1x1xf32>
    %c0_8 = arith.constant 0 : index
    %c0_9 = arith.constant 0 : index
    %c0_10 = arith.constant 0 : index
    %41 = vector.load %arg4[%c0_8, %c0_9, %c0_10] : memref<1x1x1xf32, #tpu.memory_space<vmem>>, vector<1x1x1xf32>
    tpu.vector_store %arg4[%c0_8, %c0_9, %c0_10], %40 {strides = array<i32>} : memref<1x1x1xf32, #tpu.memory_space<vmem>>, vector<1x1x1xf32>,
    return
  }
  func.func @transform_0(%arg0: i32) -> (i32, i32) {
    %c0_i32 = arith.constant 0 : i32
    %c0_i32_0 = arith.constant 0 : i32
    return %c0_i32, %arg0 : i32, i32
  }
  func.func @transform_1(%arg0: i32) -> (i32, i32) {
    %c0_i32 = arith.constant 0 : i32
    %c0_i32_0 = arith.constant 0 : i32
    return %c0_i32, %arg0 : i32, i32
  }
  func.func @transform_2(%arg0: i32) -> (i32, i32) {
    %c0_i32 = arith.constant 0 : i32
    %c0_i32_0 = arith.constant 0 : i32
    %c0_i32_1 = arith.constant 0 : i32
    return %c0_i32, %c0_i32_0 : i32, i32
  }
  func.func @transform_3(%arg0: i32) -> (i32, i32, i32) {
    %c0_i32 = arith.constant 0 : i32
    %c0_i32_0 = arith.constant 0 : i32
    %c0_i32_1 = arith.constant 0 : i32
    return %arg0, %c0_i32, %c0_i32_0 : i32, i32, i32
  }
}

</mosaic_0001>

<bundles_post_ra>
// kernel: tpu_custom_call.1
= control target key start
LH: loop header
LB: loop body
LE: loop exit
PB: predicated region body
PF: predicated region fallthrough
CT: control target
= control target key end

     0   :  { %vm26_vm0 = vcmask 1043456   ;;  %s179_s0 = inlined_call_operand.vmem [shape: f32[4,128], index: 0, kind: input, shape index: {}]   ;;  %s180_s1 = inlined_call_operand.vmem [shape: s32[1,128], index: 1, kind: input, shape index: {}]   ;;  %s181_s2 = inlined_call_operand.vmem [shape: f32[4,1], index: 2, kind: input, shape index: {}]   ;;  %s182_s3 = inlined_call_operand.hbm [shape: f32[1,1,1], index: 3, kind: output, shape index: {}]  }
   0x1   :  { %v15_v0 = vld [vmem:[%s179_s0] sm:$0xf] }
   0x2   :  { %v27_v1 = vsel %vm26_vm0, %v15_v0, -inf }
   0x3   :  { %8 = vsyncpa [#allocation3], 0  ;;  %v28_v2 = vrot.slane %v27_v1, 4  ;;  %v17_v4 = vlaneseq  ;;  %v99_v9 = vld [vmem:[%s180_s1] ss:$0 sm:$0xff]  ;;  %v136_v13 = vmov 0.0  }
   0x4   :  { %vm71_vm3 = vcmask 1040384   ;;  %s137_s0 = smov [#allocation2]   ;;  %vm83_vm4 = vcmask 0  }
   0x5   :  { %v29_v3 = vmax.f32 %v27_v1, %v28_v2  ;;  %v18_v7 = vshrl.u32 %v17_v4, 7  ;;  %v63_v36 = vand.u32 127, %v17_v4  ;;  %s91_s1 = sshll.u32 %s137_s0, 4  ;;  %s92_s1 = int_to_ptr.vmem [resolvable:$true] %s91_s1 }
   0x6   :  { %s112_s16 = scalar_lea.vmem %s92_s1, 16  ;;  %s116_s17 = scalar_lea.vmem %s92_s1, 32 }
   0x7   :  { %v30_v5 = vrot.slane %v29_v3, 2  ;;  %vm23_vm1 = vcmp.eq.s32.totalorder %v18_v7, %v99_v9  ;;  %vm67_vm2 = vcmp.lt.s32.totalorder %v63_v36, 16  ;;  %p113_p0 = scmp.ne.s32.totalorder %s92_s1, %s112_s16  ;;  %p117_p1 = scmp.lt.s32.totalorder %s92_s1, %s92_s1 }
   0x8   :  { %v100_v14 = vsel %vm23_vm1, 1.0, %v136_v13  ;;  %v101_v41 = vsel %vm67_vm2, 1.0, %v136_v13  ;;  %p118_p2 = scmp.lt.s32.totalorder %s116_s17, %s112_s16 }
   0x9   :  { %v31_v6 = vmax.f32 %v29_v3, %v30_v5  ;;  %v44_v15 = vmul.f32 %v100_v14, %v15_v0 }
   0xa   :  { %p119_p3 = por %p118_p2, %p117_p1 }
   0xb   :  { %v32_v8 = vrot.slane %v31_v6, 1  ;;  %v45_v16 = vsel %vm26_vm0, %v44_v15, 0.0 }
   0xc   :  { %v46_v17 = vrot.slane %v45_v16, 4  ;;  %p120_p4 = pnand %p119_p3, %p113_p0 }
   0xd   :  { %v33_v10 = vmax.f32 %v31_v6, %v32_v8 }
   0xe   :  { %v47_v21 = vadd.f32 %v46_v17, %v45_v16 }
   0xf   :  { %v34_v11 = vsub.f32 %v15_v0, %v33_v10 }
  0x10   :  { %v48_v24 = vrot.slane %v47_v21, 2 }
  0x11   :  { %v35_v12 = vmul.f32 1.442695, %v34_v11 }
  0x12   :  { %v49_v27 = vadd.f32 %v48_v24, %v47_v21 }
  0x13   :  { %106 = vpow2.f32 %v35_v12 }
  0x14   :  { %v50_v29 = vrot.slane %v49_v27, 1 }
  0x16   :  { %v51_v30 = vadd.f32 %v50_v29, %v49_v27 }
  0x18   :  { %v52_v31 = vsub.f32 %v51_v30, %v33_v10 }
  0x1d   :  { %v107_v18 = vpop.eup %106 }
  0x1e   :  { %v37_v19 = vsel %vm26_vm0, %v107_v18, 0.0 }
  0x1f   :  { %v38_v20 = vrot.slane %v37_v19, 4 }
  0x21   :  { %v39_v22 = vadd.f32 %v38_v20, %v37_v19 }
  0x23   :  { %v40_v23 = vrot.slane %v39_v22, 2 }
  0x25   :  { %v41_v25 = vadd.f32 %v40_v23, %v39_v22 }
  0x27   :  { %v42_v26 = vrot.slane %v41_v25, 1 }
  0x29   :  { %v43_v28 = vadd.f32 %v42_v26, %v41_v25 }
  0x2b   :  { %108 = vlog2.f32 %v43_v28 }
  0x35   :  { %v109_v32 = vpop.eup %108 }
  0x36   :  { %v54_v33 = vmul.f32 0.6931472, %v109_v32 }
  0x38   :  { %v55_v34 = vsub.f32 %v52_v31, %v54_v33 }
  0x3a   :  { %v56_v35 = vmul.f32 1.442695, %v55_v34 }
  0x3c   :  { %110 = vpow2.f32 %v56_v35 }
  0x46   :  { %v111_v37 = vpop.eup %110 }
  0x47   :  { %v58_v38 = vsub.f32 1.0, %v111_v37 }
  0x49   :  { %v59_v39 = vmul.f32 %v58_v38, %v58_v38 }
  0x4b   :  { %v60_v40 = vsub.f32 0.0, %v59_v39 }
  0x4d   :  { %v61_v42 = vmul.f32 %v60_v40, %v55_v34 }
  0x4f   :  { %v70_v43 = vmul.f32 %v101_v41, %v61_v42 }
  0x51   :  { %v72_v44 = vsel %vm71_vm3, %v70_v43, 0.0 }
  0x52   :  { %73 = vadd.xlane.f32.xlu0 %v72_v44 }
  0xdf   :  { %v74_v45 = vpop.xlane.xlu0 %73 }
  0xe0   :  { %v75_v46 = vrot.slane %v74_v45, 4 }
  0xe2   :  { %v76_v47 = vadd.f32 %v75_v46, %v74_v45 }
  0xe4   :  { %v77_v48 = vrot.slane %v76_v47, 2 }
  0xe6   :  { %v78_v49 = vadd.f32 %v77_v48, %v76_v47 }
  0xe8   :  { %v79_v50 = vrot.slane %v78_v49, 1 }
  0xea   :  { %v80_v51 = vadd.f32 %v79_v50, %v78_v49 }
  0xec   :  { %102 = vpush %v80_v51 }
 0x11d   :  { %s103_s15 = spop %102 }
 0x11e   :  { %v82_v52 = vstv %s103_s15 }
 0x11f   :  { %84 = vst.msk [vmem:[#allocation2] sm:$0x1] %vm83_vm4, %v82_v52 }
 0x120   :  { %123 = shalt.err (!%p120_p4)
}
 0x121   :  { %s124_s20 = scalar_lea.hbm %s182_s3, 16 }
 0x122   :  { %p125_p5 = scmp.ne.s32.totalorder %s182_s3, %s124_s20  ;;  %p128_p6 = scmp.lt.u32.totalorder %s124_s20, %s182_s3 }
 0x124   :  { %p130_p7 = pnand %p128_p6, %p125_p5 }
 0x126   :  { %133 = shalt.err (!%p130_p7)
}
 0x127   :  { %94 = dma.vmem_to_hbm [thread:$0]  %s92_s1, 16, %s182_s3, [#allocation3]  }
 0x128   :  { %134 = dma.done.wait [#allocation3], 16  }
 0x129   :  { %135 = vsyncadd [#allocation3], 4294967280 }
 0x12a   :  { %98 = vsyncpa [#allocation3], 1 }

</bundles_post_ra>
